<compile_context>
chip_gen: v7x
topology: tpu7x:2x2x1
jax: 0.10.0
libtpu: 0.0.40
codegen_flags: <defaults>
</compile_context>

<pallas_src>
import jax
import jax.numpy as jnp
from jax import lax
from jax.experimental import pallas as pl
from jax.experimental.pallas import tpu as pltpu


def _kv_projection_kernel(x_ref, wk_ref, wvT_ref, k_ref, v_ref):
    """1x1 key/value convs as matmuls.

    x_ref: (1, C, tn) bf16;  wk_ref: (C, Cq) bf16;  wvT_ref: (C, C) bf16 (= wv^T).
    Outputs: k (1, tn, Cq) bf16 (n-major, for a canonical phase-2 energy matmul),
             v (1, C, tn) bf16 (channel-major, lane-dense store).
    """
    x = x_ref[0]                                                   # (C, tn) bf16
    # Value projection (the big phase-1 matmul), canonical [C,C] x [C,tn]:
    #   v[d, n] = sum_c wv[c, d] * x[c, n] = sum_c wvT[d, c] * x[c, n]
    v = jnp.dot(wvT_ref[...], x, preferred_element_type=jnp.float32)   # (C, tn)
    v_ref[0] = v.astype(jnp.bfloat16)
    # Key projection stored n-major: k[n, d] = sum_c x[c, n] * wk[c, d].
    # (Transposed-LHS contraction; Mosaic lowers this directly.  It is the
    # small phase-1 matmul (Cq = C/8) and phase 1 is HBM-bound.)
    k = lax.dot_general(x, wk_ref[...], (((0,), (0,)), ((), ())),
                        preferred_element_type=jnp.float32)        # (tn, Cq)
    k_ref[0] = k.astype(jnp.bfloat16)


def _position_attention_kernel(x_ref, wqT_ref, k_ref, v_ref, gamma_ref, o_ref):
    """One (batch, query-tile) step, transposed-energy form (all matmuls canonical).

    x_ref: (1, C, tq) f32 residual slab (also the source for q);
    wqT_ref: (Cq, C) bf16 resident;  k_ref: (1, N, Cq) bf16 resident;
    v_ref: (1, C, N) bf16 resident;  gamma_ref: (1,) f32 in SMEM;
    o_ref: (1, C, tq) f32.
    """
    x_res = x_ref[0]                                               # (C, tq) f32
    x_bf = x_res.astype(jnp.bfloat16)
    # q[d, n] = sum_c wq[c, d] * x[c, n]          -- canonical [Cq,C] x [C,tq]
    q = jnp.dot(wqT_ref[...], x_bf, preferred_element_type=jnp.float32)
    # energy^T[m, n] = sum_d k[m, d] * q[d, n]    -- canonical [N,Cq] x [Cq,tq]
    e_t = jnp.dot(k_ref[0], q.astype(jnp.bfloat16),
                  preferred_element_type=jnp.float32)              # (N, tq)
    # Softmax over the key axis (axis 0 of energy^T).  Normalization is
    # deferred to a (1, tq) post-matmul scale fused with gamma.
    p = jnp.exp(e_t - jnp.max(e_t, axis=0, keepdims=True))         # (N, tq) f32
    denom = jnp.sum(p, axis=0, keepdims=True)                      # (1, tq)
    # out_unnorm[c, n] = sum_m v[c, m] * p[m, n]  -- canonical [C,N] x [N,tq]
    out = jnp.dot(v_ref[0], p.astype(jnp.bfloat16),
                  preferred_element_type=jnp.float32)              # (C, tq)
    # EUP approx reciprocal on a tiny (1, tq) vector; covered by test tolerance.
    scale = gamma_ref[0] * pl.reciprocal(denom, approx=True)       # (1, tq)
    o_ref[0] = out * scale + x_res


def _pick_tile(n, preferred):
    """Largest multiple of 128 that is <= preferred and divides n, else n.

    Valid block sizes on the minor (lane) axis are multiples of 128 or the
    full extent, so non-dividing spatial sizes fall back to a single tile
    instead of failing.
    """
    if n <= preferred:
        return n
    t = (preferred // 128) * 128
    while t >= 128:
        if n % t == 0:
            return t
        t -= 128
    return n


def position_attention(x_nchw, wq, wk, wv, gamma, *, tq=256, tn=512,
                       vmem_limit_bytes=48 * 1024 * 1024):
    """x_nchw: (B, C, H, W); wq/wk: (C, C//8), wv: (C, C) as (in, out) matrices
    of the 1x1 convs; gamma: scalar.  Returns (B, C, H, W) f32.

    Defaults are sized for v7x (64 MiB VMEM/TC).  On v5e/v6e (128 MiB VMEM)
    prefer tq=512 and vmem_limit_bytes ~= 96 MiB.
    """
    B, C, H, W = x_nchw.shape
    N = H * W
    Cq = wq.shape[1]

    # Free layout change: NCHW -> (B, C, N).  No HBM transpose passes.
    x_f32 = x_nchw.reshape(B, C, N).astype(jnp.float32)    # phase-2 residual
    x_bf = x_f32.astype(jnp.bfloat16)                      # phase-1 stream (half DMA)
    wqT_b = wq.T.astype(jnp.bfloat16)                      # (Cq, C)
    wk_b = wk.astype(jnp.bfloat16)                         # (C, Cq)
    wvT_b = wv.T.astype(jnp.bfloat16)                      # (C, C)
    gamma_arr = jnp.asarray(gamma, jnp.float32).reshape(1)

    tn = _pick_tile(N, tn)
    tq = _pick_tile(N, tq)

    cparams = pltpu.CompilerParams(
        dimension_semantics=("parallel", "parallel"),
        vmem_limit_bytes=vmem_limit_bytes,
    )

    # Phase 1: key + value 1x1 convs (q is folded into phase 2).
    k_nm, v_cm = pl.pallas_call(
        _kv_projection_kernel,
        out_shape=(
            jax.ShapeDtypeStruct((B, N, Cq), jnp.bfloat16),
            jax.ShapeDtypeStruct((B, C, N), jnp.bfloat16),
        ),
        grid_spec=pltpu.PrefetchScalarGridSpec(
            num_scalar_prefetch=0,
            grid=(B, N // tn),
            in_specs=[
                pl.BlockSpec((1, C, tn), lambda b, i: (b, 0, i)),
                pl.BlockSpec((C, Cq), lambda b, i: (0, 0)),
                pl.BlockSpec((C, C), lambda b, i: (0, 0)),
            ],
            out_specs=[
                pl.BlockSpec((1, tn, Cq), lambda b, i: (b, i, 0)),
                pl.BlockSpec((1, C, tn), lambda b, i: (b, 0, i)),
            ],
        ),
        compiler_params=cparams,
    )(x_bf, wk_b, wvT_b)

    # Phase 2: attention over query tiles -- an (N, tq) slab, never full (N, N).
    # k/v/wqT index maps are constant along the query axis so they stay
    # VMEM-resident across query tiles (re-DMA only on batch change).
    # NOTE: pipeline_mode=pl.Buffered(1) on the k/v specs would halve their
    # resident VMEM (useful when growing tq/N on v7x); left at the default
    # double-buffering here since VMEM is not the binding constraint at these
    # tile sizes.
    out_bcn = pl.pallas_call(
        _position_attention_kernel,
        out_shape=jax.ShapeDtypeStruct((B, C, N), jnp.float32),
        grid_spec=pltpu.PrefetchScalarGridSpec(
            num_scalar_prefetch=0,
            grid=(B, N // tq),
            in_specs=[
                pl.BlockSpec((1, C, tq), lambda b, i: (b, 0, i)),     # x residual slab
                pl.BlockSpec((Cq, C), lambda b, i: (0, 0)),           # wq^T (resident)
                pl.BlockSpec((1, N, Cq), lambda b, i: (b, 0, 0)),     # k (resident)
                pl.BlockSpec((1, C, N), lambda b, i: (b, 0, 0)),      # v (resident)
                pl.BlockSpec(memory_space=pltpu.MemorySpace.SMEM),    # gamma scalar
            ],
            out_specs=pl.BlockSpec((1, C, tq), lambda b, i: (b, 0, i)),
        ),
        compiler_params=cparams,
    )(x_f32, wqT_b, k_nm, v_cm, gamma_arr)

    return out_bcn.reshape(B, C, H, W)


def reference(x_nchw, wq, wk, wv, gamma):
    """Pure-JAX f32 reference mirroring the PyTorch forward (NCHW)."""
    B, C, H, W = x_nchw.shape
    N = H * W
    x_bcn = x_nchw.reshape(B, C, N)
    q = jnp.einsum("bcn,cd->bdn", x_bcn, wq)            # (B, Cq, N)
    k = jnp.einsum("bcn,cd->bdn", x_bcn, wk)            # (B, Cq, N)
    v = jnp.einsum("bcn,cd->bdn", x_bcn, wv)            # (B, C, N)
    energy = jnp.einsum("bdn,bdm->bnm", q, k)           # (B, N, N)
    attn = jax.nn.softmax(energy, axis=-1)
    out = jnp.einsum("bcm,bnm->bcn", v, attn)           # (B, C, N)
    return gamma * out.reshape(B, C, H, W) + x_nchw


if __name__ == "__main__":
    B, C, H, W = 2, 16, 8, 8          # in_channels=16 -> query/key channels = 2
    key = jax.random.PRNGKey(0)
    kx, kq, kk, kv = jax.random.split(key, 4)

    x = jax.random.normal(kx, (B, C, H, W), jnp.float32)
    # Conv2d(C, C//8, 1, bias=False) weights expressed as (C_in, C_out) matrices.
    wq = jax.random.normal(kq, (C, C // 8), jnp.float32) * 0.1
    wk = jax.random.normal(kk, (C, C // 8), jnp.float32) * 0.1
    wv = jax.random.normal(kv, (C, C), jnp.float32) * 0.1
    # Module inits gamma to 0; use a nonzero deterministic value so the
    # attention path actually contributes to the output.
    gamma = jnp.float32(0.5)

    out = jax.block_until_ready(position_attention(x, wq, wk, wv, gamma))
    ref = reference(x, wq, wk, wv, gamma)
    assert out.shape == (B, C, H, W)
    max_err = float(jnp.max(jnp.abs(out - ref)))
    # bf16 matmul operands (f32 accumulation) + approx reciprocal -> relaxed
    # tolerance vs the f32 reference.
    assert jnp.allclose(out, ref, atol=2e-2, rtol=2e-2), max_err
    print("KERNEL_OK")
</pallas_src>

<mosaic_0001>
module attributes {stable_mosaic.version = 11 : i64} {
  func.func @_kv_projection_kernel(%arg0: i32, %arg1: i32, %arg2: memref<1x16x64xbf16, #tpu.memory_space<vmem>>, %arg3: memref<16x2xbf16, #tpu.memory_space<vmem>>, %arg4: memref<16x16xbf16, #tpu.memory_space<vmem>>, %arg5: memref<1x64x2xbf16, #tpu.memory_space<vmem>>, %arg6: memref<1x16x64xbf16, #tpu.memory_space<vmem>>) attributes {dimension_semantics = [#tpu.dimension_semantics<parallel>, #tpu.dimension_semantics<parallel>], iteration_bounds = array<i64: 2, 1>, scalar_prefetch = 0 : i64, scratch_operands = 0 : i64, tpu.core_type = #tpu.core_type<tc>, window_params = [{transform_indices = @transform_0, window_bounds = array<i64: 1, 16, 64>}, {pipeline_mode = #tpu.pipeline_mode<synchronous>, transform_indices = @transform_1, window_bounds = array<i64: 16, 2>}, {pipeline_mode = #tpu.pipeline_mode<synchronous>, transform_indices = @transform_2, window_bounds = array<i64: 16, 16>}, {transform_indices = @transform_3, window_bounds = array<i64: 1, 64, 2>}, {transform_indices = @transform_4, window_bounds = array<i64: 1, 16, 64>}]} {
    %c0 = arith.constant 0 : index
    %c0_0 = arith.constant 0 : index
    %c0_1 = arith.constant 0 : index
    %0 = vector.load %arg2[%c0, %c0_0, %c0_1] : memref<1x16x64xbf16, #tpu.memory_space<vmem>>, vector<1x16x64xbf16>
    %1 = vector.shape_cast %0 : vector<1x16x64xbf16> to vector<16x64xbf16>
    %c0_2 = arith.constant 0 : index
    %c0_3 = arith.constant 0 : index
    %2 = vector.load %arg4[%c0_2, %c0_3] : memref<16x16xbf16, #tpu.memory_space<vmem>>, vector<16x16xbf16>
    %cst = arith.constant dense<0.000000e+00> : vector<16x64xf32>
    %3 = tpu.matmul %2, %1, %cst {dimension_numbers = #tpu.dot_dimension_numbers<[1], [0], [0], [1], [0, 0, 1, 1], [], []>} : vector<16x16xbf16>, vector<16x64xbf16>, vector<16x64xf32> -> vector<16x64xf32>
    %4 = arith.truncf %3 : vector<16x64xf32> to vector<16x64xbf16>
    %c0_4 = arith.constant 0 : index
    %c0_5 = arith.constant 0 : index
    %c0_6 = arith.constant 0 : index
    %5 = vector.load %arg6[%c0_4, %c0_5, %c0_6] : memref<1x16x64xbf16, #tpu.memory_space<vmem>>, vector<1x16x64xbf16>
    %6 = vector.shape_cast %5 : vector<1x16x64xbf16> to vector<16x64xbf16>
    %7 = vector.shape_cast %4 : vector<16x64xbf16> to vector<1x16x64xbf16>
    tpu.vector_store %arg6[%c0_4, %c0_5, %c0_6], %7 {strides = array<i32>} : memref<1x16x64xbf16, #tpu.memory_space<vmem>>, vector<1x16x64xbf16>,
    %c0_7 = arith.constant 0 : index
    %c0_8 = arith.constant 0 : index
    %8 = vector.load %arg3[%c0_7, %c0_8] : memref<16x2xbf16, #tpu.memory_space<vmem>>, vector<16x2xbf16>
    %cst_9 = arith.constant dense<0.000000e+00> : vector<64x2xf32>
    %9 = tpu.matmul %1, %8, %cst_9 {dimension_numbers = #tpu.dot_dimension_numbers<[0], [0], [1], [1], [0, 1, 1, 1], [], []>} : vector<16x64xbf16>, vector<16x2xbf16>, vector<64x2xf32> -> vector<64x2xf32>
    %10 = arith.truncf %9 : vector<64x2xf32> to vector<64x2xbf16>
    %c0_10 = arith.constant 0 : index
    %c0_11 = arith.constant 0 : index
    %c0_12 = arith.constant 0 : index
    %11 = vector.load %arg5[%c0_10, %c0_11, %c0_12] : memref<1x64x2xbf16, #tpu.memory_space<vmem>>, vector<1x64x2xbf16>
    %12 = vector.shape_cast %11 : vector<1x64x2xbf16> to vector<64x2xbf16>
    %13 = vector.shape_cast %10 : vector<64x2xbf16> to vector<1x64x2xbf16>
    tpu.vector_store %arg5[%c0_10, %c0_11, %c0_12], %13 {strides = array<i32>} : memref<1x64x2xbf16, #tpu.memory_space<vmem>>, vector<1x64x2xbf16>,
    return
  }
  func.func @transform_0(%arg0: i32, %arg1: i32) -> (i32, i32, i32) {
    %c0_i32 = arith.constant 0 : i32
    %c0_i32_0 = arith.constant 0 : i32
    return %arg0, %c0_i32, %arg1 : i32, i32, i32
  }
  func.func @transform_1(%arg0: i32, %arg1: i32) -> (i32, i32) {
    %c0_i32 = arith.constant 0 : i32
    %c0_i32_0 = arith.constant 0 : i32
    %c0_i32_1 = arith.constant 0 : i32
    return %c0_i32, %c0_i32_0 : i32, i32
  }
  func.func @transform_2(%arg0: i32, %arg1: i32) -> (i32, i32) {
    %c0_i32 = arith.constant 0 : i32
    %c0_i32_0 = arith.constant 0 : i32
    %c0_i32_1 = arith.constant 0 : i32
    return %c0_i32, %c0_i32_0 : i32, i32
  }
  func.func @transform_3(%arg0: i32, %arg1: i32) -> (i32, i32, i32) {
    %c0_i32 = arith.constant 0 : i32
    %c0_i32_0 = arith.constant 0 : i32
    return %arg0, %arg1, %c0_i32 : i32, i32, i32
  }
  func.func @transform_4(%arg0: i32, %arg1: i32) -> (i32, i32, i32) {
    %c0_i32 = arith.constant 0 : i32
    %c0_i32_0 = arith.constant 0 : i32
    return %arg0, %c0_i32, %arg1 : i32, i32, i32
  }
}

</mosaic_0001>

<bundles_post_ra>
// kernel: tpu_custom_call.1
= control target key start
LH: loop header
LB: loop body
LE: loop exit
PB: predicated region body
PF: predicated region fallthrough
CT: control target
= control target key end

     0   :  { %10 = vsyncpa [#allocation3], 0  ;;  %s1105_s0 = inlined_call_operand.hbm [shape: bf16[2,16,64], index: 0, kind: input, shape index: {}]   ;;  %s1106_s1 = inlined_call_operand.vmem [shape: bf16[16,2], index: 1, kind: input, shape index: {}]   ;;  %s1107_s2 = inlined_call_operand.vmem [shape: bf16[16,16], index: 2, kind: input, shape index: {}]   ;;  %s1108_s3 = inlined_call_operand.vmem [shape: bf16[2,64,2], index: 3, kind: output, shape index: {0}]   ;;  %s1109_s4 = inlined_call_operand.hbm [shape: bf16[2,16,64], index: 4, kind: output, shape index: {1}]  }
   0x1   :  { %12 = vsyncpa [#allocation3 + $0x1], 0 }
   0x2   :  { %13 = vsyncpa [#allocation4], 0 }
   0x3   :  { %15 = vsyncpa [#allocation4 + $0x1], 0  ;;  %s911_s15 = smov 0   ;;  %s913_s16 = smov 0  }
   0x4   :  { %s915_s17 = smov 0   ;;  %s917_s18 = smov 0  }
   0x5   :  { %s919_s19 = smov 0   ;;  %s921_s20 = smov 0  }
   0x6 LB: > { %s621_s21 = sadd.s32 4294967295, %s876_s20   ;;  %s622_s22 = sadd.s32 4294967294, %s876_s20   ;;  %s876_s20 = sphi %s921_s20, %s21_s20   ;;  %s872_s19 = sphi %s919_s19, %s1124_s19   ;;  %s868_s18 = sphi %s917_s18, %s1123_s18   ;;  %s864_s17 = sphi %s915_s17, %s1122_s17   ;;  %s860_s16 = sphi %s913_s16, %s1121_s16   ;;  %s856_s15 = sphi %s911_s15, %s1120_s15  }
   0x7   : > { %s33_s23 = sadd.s32 1, %s872_s19  ;;  %s42_s24 = sadd.s32 1, %s864_s17 }
   0x8   : > { %p35_p0 = scmp.ge.s32.totalorder %s33_s23, 2  ;;  %p49_p1 = scmp.ne.s32.totalorder %s864_s17, %s860_s16 }
   0x9   : > { %p50_p2 = scmp.eq.s32.totalorder %s876_s20, 0  ;;  %p55_p3 = scmp.ne.s32.totalorder %s860_s16, %s856_s15 }
   0xa   : > { %s1126_s23 = smov (%p35_p0, %s33_s23), 0  ;;  %p56_p5 = scmp.eq.s32.totalorder %s621_s21, 0 }
   0xb   : > { %p952_p4 = por %p50_p2, %p49_p1  ;;  %s37_s26 = ssub.s32 %s872_s19, %s1126_s23 }
   0xc   : > { %p151_p6 = scmp.eq.s32.totalorder %s621_s21, 1  ;;  %p40_p7 = scmp.eq.s32.totalorder %s37_s26, 0 }
   0xd   : > { %p958_p8 = por %p56_p5, %p55_p3  ;;  %p157_p10 = scmp.eq.s32.totalorder %s622_s22, 1 }
   0xe   : > { %p962_p9 = por %p151_p6, %p49_p1  ;;  %p704_p13 = scmp.lt.s32.totalorder %s876_s20, 2 }
   0xf   : > { %s967_s29 = scalar_select %p40_p7, %s864_s17, %s42_s24  }
  0x10   : > { %s1113_s28 = scalar_select %p962_p9, 1, 0 }
  0x11   : > { %p969_p11 = por %p157_p10, %p55_p3  ;;  %s183_s5 = sand.u32 1, %s864_s17  }
  0x12   : > { %s625_s6 = sshll.u32 %s183_s5, 3  ;;  %s656_s7 = sshll.u32 %s872_s19, 7 }
  0x13   : > { %s1114_s30 = scalar_select %p969_p11, 1, 0 }
  0x14   : > { %s980_s10 = scalar_lea.hbm %s1105_s0, %s656_s7  ;;  %s187_s11 = scalar_lea.vmem [#allocation2], %s625_s6 }
  0x15   : > { %s195_s12 = sshll.u32 %s187_s11, 4  ;;  %p986_p0 = pnand %p704_p13, %p952_p4  ;;  %s982_s12 = int_to_ptr.vmem [resolvable:$true] %s195_s12 }
  0x16   : > { %s991_s14 = scalar_lea.sflag [#allocation3], %s183_s5  ;;  %s764_s21 = scalar_lea.hbm %s980_s10, 128 }
  0x17   : > { %p765_p2 = scmp.ne.s32.totalorder %s980_s10, %s764_s21  ;;  %p766_p3 = pneg %p986_p0 }
  0x18   : > { %s769_s25 = scalar_lea.hbm %s1105_s0, 256  ;;  %p770_p4 = scmp.lt.u32.totalorder %s980_s10, %s1105_s0 }
  0x19   : > { %p767_p5 = pnand %p766_p3, %p765_p2  ;;  %p771_p7 = scmp.lt.u32.totalorder %s769_s25, %s764_s21 }
  0x1a   : > { %p773_p13 = scmp.lt.u32.totalorder %s764_s21, %s980_s10 }
  0x1b   : > { %p768_p6 = pneg %p767_p5  ;;  %p772_p10 = por %p771_p7, %p770_p4 }
  0x1d   : > { %p774_p12 = por %p773_p13, %p772_p10 }
  0x1f   : > { %p775_p1 = pnand %p774_p12, %p768_p6 }
  0x21   : > { %778 = shalt.err (!%p775_p1)
}
  0x22   : > { %s779_s5 = scalar_lea.vmem %s982_s12, 128  ;;  %s878_s7 = smov [#allocation2]  }
  0x23   : > { %p780_p2 = scmp.ne.s32.totalorder %s982_s12, %s779_s5  ;;  %s784_s8 = sshll.u32 %s878_s7, 4  ;;  %s785_s8 = int_to_ptr.vmem [resolvable:$false] %s784_s8 }
  0x24   : > { %s786_s9 = scalar_lea.vmem %s785_s8, 256  ;;  %p787_p9 = scmp.lt.s32.totalorder %s982_s12, %s785_s8 }
  0x25   : > { %p782_p5 = pnand %p780_p2, %p766_p3  ;;  %p788_p4 = scmp.lt.s32.totalorder %s786_s9, %s779_s5 }
  0x27   : > { %p783_p11 = pneg %p782_p5  ;;  %p789_p7 = por %p788_p4, %p787_p9 }
  0x29   : > { %p790_p10 = pnand %p789_p7, %p783_p11 }
  0x2b   : > { %793 = shalt.err (!%p790_p10)
}
  0x2c   : > { %s879_s11 = smov 64   ;;  %s880_s21 = smov 4  }
  0x2d   : > { %699 = dma.hbm_to_vmem [thread:$0]  (!%p986_p0), %s980_s10, 128, %s982_s12, %s991_s14, %s879_s11, %s879_s11, %s880_s21  }
  0x2e   : > { %p203_p12 = scmp.lt.s32.totalorder %s876_s20, 3  ;;  %p1116_p1 = scmp.ge.s32.totalorder %s876_s20, 1 }
  0x30   : > { %p204_p3 = pnand %p1116_p1, %p203_p12 }
  0x31   : > { %s1023_s22 = sand.u32 (!%p204_p3), 1, %s860_s16  }
  0x32   : > { %207 = sbr.rel (%p204_p3) target bundleno = 393 (0x189), region = 32  ;;  %s629_s24 = sshll.u32 (!%p204_p3), %s1023_s22, 3 }
  0x33   : > { %s210_s25 = scalar_lea.sflag (!%p204_p3), [#allocation3], %s1023_s22  ;;  %s213_s26 = scalar_lea.vmem (!%p204_p3), [#allocation2], %s629_s24 }
  0x39   : > { %847 = dma.done.wait (%p958_p8), %s210_s25, 128  }
  0x3a   : > { %849 = vsyncadd (%p958_p8), %s210_s25, 4294967168  ;;  %v881_v0 = vmov 0.0   ;;  %vm882_vm0 = vmmov 0   ;;  %v761_v1 = vld [vmem:[%s213_s26] sm:$0xff]   ;;  %vm273_vm1 = vcmask 130048   ;;  %s246_s27 = scalar_lea.vmem [#allocation5], %s629_s24 }
  0x3b   : > { %676 = vmatprep.subr.bf16.mxu0 %v881_v0  ;;  %678 = vmatprep.mubr.msk.bf16.mxu0 %vm882_vm0, %v881_v0  ;;  %v762_v2 = vld [vmem:[%s1106_s1] sm:$0xff]   ;;  %s499_s6 = sshll.u32 %s246_s27, 4  ;;  %s668_s5 = sshll.u32 %s868_s18, 7  ;;  %vm326_vm2 = vcmask 519168   ;;  %s1038_s6 = int_to_ptr.vmem [resolvable:$true] %s499_s6 }
  0x3c   : > { %331 = vxpose.xlu0.c.b16.start.end [1/1] (short) (narrow) %v761_v1, 64  ;;  %677 = vmatpush3.bf16.msra.mxu0 %v761_v1  ;;  %v763_v3 = vld [vmem:[%s1107_s2] sm:$0xff]   ;;  %s1043_s9 = scalar_lea.hbm %s1109_s4, %s668_s5  ;;  %s481_s11 = scalar_lea.sflag [#allocation4], %s1023_s22 }
  0x3d   : > { %682 = vmatprep.subr.bf16.mxu1 %v762_v2  ;;  %s794_s21 = scalar_lea.vmem %s1038_s6, 128  ;;  %p1117_p9 = scmp.ne.s32.totalorder %s1113_s28, 0 }
  0x3e   : > { %683 = vmatpush3.bf16.msra.mxu1 %v762_v2  ;;  %p795_p8 = scmp.ne.s32.totalorder %s1038_s6, %s794_s21  ;;  %s883_s24 = smov [#allocation5]  }
  0x3f   : > { %679 = vmatmul.mubr.msk.bf16.vlgmr.msra.gmra.mrb[0].mxu0 %vm273_vm1, %v763_v3  ;;  %s798_s25 = sshll.u32 %s883_s24, 4  ;;  %s799_s25 = int_to_ptr.vmem [resolvable:$false] %s798_s25 }
  0x40   : > { %p796_p11 = pnand %p795_p8, %p1117_p9  ;;  %s800_s26 = scalar_lea.vmem %s799_s25, 256 }
  0x41   : > { %p801_p6 = scmp.lt.s32.totalorder %s1038_s6, %s799_s25  ;;  %p802_p13 = scmp.lt.s32.totalorder %s800_s26, %s794_s21 }
  0x42   : > { %p797_p0 = pneg %p796_p11 }
  0x43   : > { %p803_p2 = por %p802_p13, %p801_p6 }
  0x45   : > { %p804_p5 = pnand %p803_p2, %p797_p0 }
  0xa2   : > { %v339_v4 = vpop.trf.xlu0 }
  0xa3   : > { %684 = vmatprep.mubr.msk.bf16.mxu1 %vm273_vm1, %v339_v4 }
  0xa6   : > { %v340_v5 = vpop.trf.xlu0 }
  0xa7   : > { %685 = vmatmul.mubr.msk.bf16.vlgmr.msra.gmra.mrb[0].mxu1 %vm273_vm1, %v340_v5 }
  0xaa   : > { %v341_v6 = vpop.trf.xlu0 }
  0xab   : > { %688 = vmatprep.mubr.msk.bf16.mxu1 %vm273_vm1, %v341_v6 }
  0xae   : > { %v342_v7 = vpop.trf.xlu0 }
  0xaf   : > { %689 = vmatmul.mubr.msk.bf16.gmra.mrb[4].mxu1 %vm273_vm1, %v342_v7 }
 0x112   : > { %v311_v8 = vpop.f32.mrb[0].mxu0 }
 0x113   : > { %v658_v9 = vpack.c.bf16 %v311_v8, %v311_v8  ;;  %v680_v10 = vpop.f32.mrb[1].mxu0 }
 0x114   : > { %v314_v11 = vpop.f32.mrb[2].mxu0 }
 0x115   : > { %327 = vst.msk [vmem:[%s246_s27] sm:$0xf] %vm326_vm2, %v658_v9  ;;  %v659_v12 = vpack.c.bf16 %v314_v11, %v314_v11  ;;  %v681_v13 = vpop.f32.mrb[3].mxu0 }
 0x117   : > { %328 = vst.msk [vmem:[%s246_s27 + $0x4] sm:$0xf] %vm326_vm2, %v659_v12 }
 0x118   : > { %807 = shalt.err (!%p804_p5)
}
 0x119   : > { %s808_s10 = scalar_lea.hbm %s1043_s9, 128  ;;  %s812_s14 = scalar_lea.hbm %s1109_s4, 256 }
 0x11a   : > { %p809_p4 = scmp.ne.s32.totalorder %s1043_s9, %s808_s10  ;;  %p813_p12 = scmp.lt.u32.totalorder %s1043_s9, %s1109_s4 }
 0x11b   : > { %p814_p1 = scmp.lt.u32.totalorder %s812_s14, %s808_s10  ;;  %p816_p8 = scmp.lt.u32.totalorder %s808_s10, %s1043_s9 }
 0x11c   : > { %p810_p7 = pnand %p809_p4, %p1117_p9 }
 0x11d   : > { %p815_p3 = por %p814_p1, %p813_p12 }
 0x11e   : > { %p811_p10 = pneg %p810_p7 }
 0x11f   : > { %p817_p11 = por %p816_p8, %p815_p3 }
 0x121   : > { %p818_p0 = pnand %p817_p11, %p811_p10 }
 0x123   : > { %821 = shalt.err (!%p818_p0)
}
 0x124   : > { %s884_s7 = smov 64   ;;  %s885_s8 = smov 4   ;;  %vm462_vm3 = vcmask 11264  }
 0x125   : > { %694 = dma.vmem_to_hbm [thread:$0]  (%p1117_p9), %s1038_s6, 128, %s1043_s9, %s481_s11, %s884_s7, %s884_s7, %s885_s8  }
 0x126   : > { %p248_p6 = scmp.lt.s32.totalorder %s868_s18, 1 }
 0x128   : > { %s1128_s18 = smov (!%p248_p6, %s868_s18), 1 }
 0x129   : > { %s657_s21 = sshll.u32 %s1128_s18, 5 }
 0x12a   : > { %s255_s26 = scalar_lea.vmem %s1108_s3, %s657_s21 }
 0x17a   : > { %v686_v14 = vpop.f32.mrb[0].mxu1 }
 0x17b   : > { %v662_v15 = vpack.c.bf16 %v686_v14, %v686_v14  ;;  %v399_v16 = vpop.f32.mrb[1].mxu1 }
 0x17c   : > { %v660_v17 = vpack.c.bf16 %v399_v16, %v399_v16  ;;  %v687_v18 = vpop.f32.mrb[2].mxu1 }
 0x17d   : > { %465 = vst.msk [vmem:[%s255_s26 + $0x8] sm:$0xf] %vm462_vm3, %v662_v15  ;;  %v663_v19 = vpack.c.bf16 %v687_v18, %v687_v18  ;;  %v402_v20 = vpop.f32.mrb[3].mxu1 }
 0x17e   : > { %463 = vst.msk [vmem:[%s255_s26] sm:$0xf] %vm462_vm3, %v660_v17  ;;  %v661_v21 = vpack.c.bf16 %v402_v20, %v402_v20 }
 0x17f   : > { %466 = vst.msk [vmem:[%s255_s26 + $0xc] sm:$0xf] %vm462_vm3, %v663_v19 }
 0x180   : > { %464 = vst.msk [vmem:[%s255_s26 + $0x4] sm:$0xf] %vm462_vm3, %v661_v21 }
 0x182   : > { %v690_v22 = vpop.f32.mrb[4].mxu1 }
 0x183   : > { %v666_v23 = vpack.c.bf16 %v690_v22, %v690_v22  ;;  %v415_v24 = vpop.f32.mrb[5].mxu1 }
 0x184   : > { %v664_v25 = vpack.c.bf16 %v415_v24, %v415_v24  ;;  %v691_v26 = vpop.f32.mrb[6].mxu1 }
 0x185   : > { %469 = vst.msk [vmem:[%s255_s26 + $0x18] sm:$0xf] %vm462_vm3, %v666_v23  ;;  %v667_v27 = vpack.c.bf16 %v691_v26, %v691_v26  ;;  %v418_v28 = vpop.f32.mrb[7].mxu1 }
 0x186   : > { %467 = vst.msk [vmem:[%s255_s26 + $0x10] sm:$0xf] %vm462_vm3, %v664_v25  ;;  %v665_v29 = vpack.c.bf16 %v418_v28, %v418_v28 }
 0x187   : > { %470 = vst.msk [vmem:[%s255_s26 + $0x1c] sm:$0xf] %vm462_vm3, %v667_v27 }
 0x188   : > { %468 = vst.msk [vmem:[%s255_s26 + $0x14] sm:$0xf] %vm462_vm3, %v665_v29 }
 0x189 PF: > { %s526_s18 = sand.u32 1, %s856_s15   ;;  %p1118_p9 = scmp.ne.s32.totalorder %s1114_s30, 0 }
 0x18a   : > { %p1119_p13 = scmp.ge.s32.totalorder %s876_s20, 2  ;;  %s527_s28 = scalar_lea.sflag [#allocation4], %s526_s18 }
 0x18c   : > { %p701_p2 = pnand %p1119_p13, %p1118_p9 }
 0x18e   : > { %851 = dma.done.wait (!%p701_p2), %s527_s28, 128  }
 0x18f   : > { %853 = vsyncadd (!%p701_p2), %s527_s28, 4294967168  ;;  %s21_s20 = sadd.s32 1, %s876_s20   ;;  %s1120_s15 = smov %s860_s16 }
 0x190   : > { %p18_p5 = scmp.ge.s32.totalorder %s21_s20, 4   ;;  %s1121_s16 = smov %s864_s17 }
 0x191   : > { %s1122_s17 = smov %s967_s29  ;;  %s1123_s18 = smov %s872_s19 }
 0x192   : > { %s1124_s19 = smov %s1126_s23  ;;  %20 = sbr.rel (!%p18_p5) target bundleno = 6 (0x6), region = 89 }
 0x199   :  { %532 = vsyncpa [#allocation3], 1 }
 0x19a   :  { %534 = vsyncpa [#allocation3 + $0x1], 1 }
 0x19b   :  { %535 = vsyncpa [#allocation4], 1 }
 0x19c   :  { %537 = vsyncpa [#allocation4 + $0x1], 1 }

</bundles_post_ra>
